<compile_context>
chip_gen: v7x
topology: tpu7x:2x2x1
jax: 0.10.0
libtpu: 0.0.40
codegen_flags: <defaults>
</compile_context>

<pallas_src>
import functools

import jax
import jax.numpy as jnp
from jax import lax
from jax.experimental import pallas as pl
from jax.experimental.pallas import tpu as pltpu


# ----------------------------------------------------------------------------
# Fused kernel:  MLP trunk -> heads -> corr_sds, all in VMEM.
#
# refs layout:
#   x_ref (bB, IN),
#   (w, b) * n_hidden,
#   wm, bm, ws, bs,                       # means / sds heads, columns in (t,l) order
#   [wr (rank,H,TL), br (rank,1,TL), rep (TL,TL)]   (only if rank > 0),
#   means_ref (bB, T*L), corr_ref (bB, T, T*L)
# ----------------------------------------------------------------------------
def _encoder_kernel(*refs, n_hidden, rank, T, L):
    TL = T * L
    idx = 0
    x_ref = refs[idx]; idx += 1
    hidden = []
    for _ in range(n_hidden):
        hidden.append((refs[idx], refs[idx + 1])); idx += 2
    wm_ref, bm_ref, ws_ref, bs_ref = refs[idx:idx + 4]; idx += 4
    if rank > 0:
        wr_ref, br_ref, rep_ref = refs[idx:idx + 3]; idx += 3
    means_ref, corr_ref = refs[idx], refs[idx + 1]

    bB = x_ref.shape[0]

    # ---- MLP trunk (MXU matmuls, f32 accumulation, ReLU between layers) ----
    h = x_ref[...]                                                  # (bB, IN)
    for w_ref, b_ref in hidden:
        h = jnp.dot(h, w_ref[...], preferred_element_type=jnp.float32) + b_ref[...]
        h = jnp.maximum(h, 0.0)

    # ---- means head: already lane-dense (t, l) flat layout ----
    means = jnp.dot(h, wm_ref[...], preferred_element_type=jnp.float32) + bm_ref[...]
    means_ref[...] = means.astype(means_ref.dtype)                  # (bB, T*L)

    # ---- sds head ----
    sds = jnp.dot(h, ws_ref[...], preferred_element_type=jnp.float32) + bs_ref[...]
    sds2 = sds * sds + 1e-4                                         # (bB, T*L)

    # chunk-membership mask: mask[i, j*L + l] == (j == i), built without int div
    ii = lax.broadcasted_iota(jnp.int32, (T, TL), 0)
    jj = lax.broadcasted_iota(jnp.int32, (T, TL), 1)
    mask = (jj >= ii * L) & (jj < ii * L + L)                       # (T, T*L)

    # diagonal term placed directly in the lane-dense layout (no eye multiply)
    corr = jnp.where(mask[None, :, :], sds2[:, None, :], 0.0)       # (bB, T, T*L)

    if rank > 0:
        rep = rep_ref[...]                                          # (TL, TL) 0/1
        for r in range(rank):                                       # static, small
            v = (jnp.dot(h, wr_ref[r], preferred_element_type=jnp.float32)
                 + br_ref[r])                                       # (bB, T*L)
            # vm[b, i, m] = v[b, m] if m is in chunk i else 0
            vm = jnp.where(mask[None, :, :], v[:, None, :], 0.0)    # (bB, T, T*L)
            # vrep[b, i, j*L + l] = v[b, i*L + l]   (one 2-D MXU matmul)
            vrep = jnp.dot(vm.reshape(bB * T, TL), rep,
                           preferred_element_type=jnp.float32).reshape(bB, T, TL)
            corr = corr + vrep * v[:, None, :]

    corr_ref[...] = corr.astype(corr_ref.dtype)


# ----------------------------------------------------------------------------
# One-time parameter repacking (wrapper-side "layout plumbing", not compute)
# ----------------------------------------------------------------------------
def pack_encoder_params(params, *, latent_dims, timesteps, rank):
    """Split/permute the final Linear's columns into per-head weights.

    Original output column index = t*(2+rank)*L + channel; we regroup so each
    head's columns are ordered (t, l), i.e. flat index t*L + l.  This is a
    pure column permutation, so the math is unchanged.
    """
    *hidden, w3, b3 = params
    T, L = timesteps, latent_dims
    C = (2 + rank) * L
    TL = T * L
    base = (jnp.arange(T)[:, None] * C + jnp.arange(L)[None, :]).reshape(-1)  # (T*L,)
    wm, bm = w3[:, base], b3[:, base]
    ws, bs = w3[:, base + L], b3[:, base + L]
    packed = list(hidden) + [wm, bm, ws, bs]
    if rank > 0:
        wr = jnp.stack([w3[:, base + (2 + r) * L] for r in range(rank)], axis=0)
        br = jnp.stack([b3[:, base + (2 + r) * L] for r in range(rank)], axis=0)
        k = jnp.arange(TL)
        rep = (k[:, None] % L == k[None, :] % L).astype(jnp.float32)          # (TL, TL)
        packed += [wr, br, rep]
    return tuple(packed)


# ----------------------------------------------------------------------------
# Forward wrapper
# ----------------------------------------------------------------------------
def feedforward_encoder(x, packed_params, *, latent_dims, timesteps, rank,
                        block_b=128):
    """x: (B, T, observed_dims) f32 -> (means (B,T,L), corr_sds (B,T,T,L))."""
    B, T, D = x.shape
    assert T == timesteps
    L = latent_dims
    TL = T * L
    x_flat = x.reshape(B, T * D)                     # matches torch reshape

    n_extra = 7 if rank > 0 else 4
    n_hidden = (len(packed_params) - n_extra) // 2
    bB = B if B <= block_b else block_b              # batch tile
    grid = (pl.cdiv(B, bB),)

    def resident(a):
        zeros = (0,) * a.ndim
        return pl.BlockSpec(a.shape, lambda i, zeros=zeros: zeros)

    in_specs = [pl.BlockSpec((bB, x_flat.shape[1]), lambda i: (i, 0))]
    in_specs += [resident(p) for p in packed_params]

    out_shape = (jax.ShapeDtypeStruct((B, TL), jnp.float32),        # means (flat)
                 jax.ShapeDtypeStruct((B, T, TL), jnp.float32))     # corr (lane-dense)
    out_specs = (pl.BlockSpec((bB, TL), lambda i: (i, 0)),
                 pl.BlockSpec((bB, T, TL), lambda i: (i, 0, 0)))

    kernel = functools.partial(_encoder_kernel, n_hidden=n_hidden, rank=rank,
                               T=T, L=L)
    means_flat, corr_dense = pl.pallas_call(
        kernel,
        out_shape=out_shape,
        grid=grid,
        in_specs=in_specs,
        out_specs=out_specs,
        compiler_params=pltpu.CompilerParams(
            dimension_semantics=("parallel",)),     # batch axis -> both TCs on v7x
    )(x_flat, *packed_params)

    # Free layout plumbing outside the kernel.
    means = means_flat.reshape(B, T, L)
    corr_sds = corr_dense.reshape(B, T, T, L)
    return means, corr_sds


def init_params(key, in_dims, hidden_sizes, out_dims):
    """Deterministic torch.nn.Linear-style init; weights stored (in, out)."""
    sizes = [in_dims] + list(hidden_sizes) + [out_dims]
    params = []
    for fin, fout in zip(sizes[:-1], sizes[1:]):
        key, kw, kb = jax.random.split(key, 3)
        bound = 1.0 / (fin ** 0.5)
        w = jax.random.uniform(kw, (fin, fout), jnp.float32, -bound, bound)
        b = jax.random.uniform(kb, (1, fout), jnp.float32, -bound, bound)
        params += [w, b]
    return tuple(params)


if __name__ == "__main__":
    # Small configuration consistent with the module's forward.
    batch, timesteps, observed_dims = 2, 8, 4
    latent_dims, rank = 4, 1
    hidden_sizes = (32, 32)                          # layers_list = [(32, ReLU), (32, ReLU)]

    in_dims = observed_dims * timesteps              # 32
    out_dims = latent_dims * timesteps * (2 + rank)  # 96

    key = jax.random.PRNGKey(0)
    key, kx = jax.random.split(key)
    x = jax.random.normal(kx, (batch, timesteps, observed_dims), jnp.float32)
    params = init_params(key, in_dims, hidden_sizes, out_dims)

    packed = pack_encoder_params(params, latent_dims=latent_dims,
                                 timesteps=timesteps, rank=rank)
    means, corr_sds = feedforward_encoder(
        x, packed, latent_dims=latent_dims, timesteps=timesteps, rank=rank)
    jax.block_until_ready((means, corr_sds))

    # Plain-JAX reference (original un-packed params) for sanity.
    w1, b1, w2, b2, w3, b3 = params
    u = x.reshape(batch, timesteps * observed_dims)
    u = jnp.maximum(u @ w1 + b1, 0.0)
    u = jnp.maximum(u @ w2 + b2, 0.0)
    u = u @ w3 + b3
    o3 = u.reshape(batch, timesteps, (2 + rank) * latent_dims)
    means_ref = o3[:, :, :latent_dims]
    sds_ref = o3[:, :, latent_dims:2 * latent_dims]
    eye = jnp.eye(timesteps, dtype=jnp.float32)
    corr_ref = eye[None, :, :, None] * (sds_ref ** 2 + 1e-4)[:, :, None, :]
    for r in range(rank):
        rv = o3[:, :, (r + 2) * latent_dims:(r + 3) * latent_dims]
        corr_ref = corr_ref + jnp.einsum('bil,bjl->bijl', rv, rv)

    assert means.shape == (batch, timesteps, latent_dims)
    assert corr_sds.shape == (batch, timesteps, timesteps, latent_dims)
    assert jnp.allclose(means, means_ref, atol=1e-5, rtol=1e-5)
    assert jnp.allclose(corr_sds, corr_ref, atol=1e-5, rtol=1e-5)

    print("KERNEL_OK")
</pallas_src>

<mosaic_0001>
module attributes {stable_mosaic.version = 11 : i64} {
  func.func @_encoder_kernel(%arg0: i32, %arg1: memref<2x32xf32, #tpu.memory_space<vmem>>, %arg2: memref<32x32xf32, #tpu.memory_space<vmem>>, %arg3: memref<1x32xf32, #tpu.memory_space<vmem>>, %arg4: memref<32x32xf32, #tpu.memory_space<vmem>>, %arg5: memref<1x32xf32, #tpu.memory_space<vmem>>, %arg6: memref<32x32xf32, #tpu.memory_space<vmem>>, %arg7: memref<1x32xf32, #tpu.memory_space<vmem>>, %arg8: memref<32x32xf32, #tpu.memory_space<vmem>>, %arg9: memref<1x32xf32, #tpu.memory_space<vmem>>, %arg10: memref<1x32x32xf32, #tpu.memory_space<vmem>>, %arg11: memref<1x1x32xf32, #tpu.memory_space<vmem>>, %arg12: memref<32x32xf32, #tpu.memory_space<vmem>>, %arg13: memref<2x32xf32, #tpu.memory_space<vmem>>, %arg14: memref<2x8x32xf32, #tpu.memory_space<vmem>>) attributes {dimension_semantics = [#tpu.dimension_semantics<parallel>], iteration_bounds = array<i64: 1>, scalar_prefetch = 0 : i64, scratch_operands = 0 : i64, tpu.core_type = #tpu.core_type<tc>, window_params = [{transform_indices = @transform_0, window_bounds = array<i64: 2, 32>}, {pipeline_mode = #tpu.pipeline_mode<synchronous>, transform_indices = @transform_1, window_bounds = array<i64: 32, 32>}, {pipeline_mode = #tpu.pipeline_mode<synchronous>, transform_indices = @transform_2, window_bounds = array<i64: 1, 32>}, {pipeline_mode = #tpu.pipeline_mode<synchronous>, transform_indices = @transform_3, window_bounds = array<i64: 32, 32>}, {pipeline_mode = #tpu.pipeline_mode<synchronous>, transform_indices = @transform_4, window_bounds = array<i64: 1, 32>}, {pipeline_mode = #tpu.pipeline_mode<synchronous>, transform_indices = @transform_5, window_bounds = array<i64: 32, 32>}, {pipeline_mode = #tpu.pipeline_mode<synchronous>, transform_indices = @transform_6, window_bounds = array<i64: 1, 32>}, {pipeline_mode = #tpu.pipeline_mode<synchronous>, transform_indices = @transform_7, window_bounds = array<i64: 32, 32>}, {pipeline_mode = #tpu.pipeline_mode<synchronous>, transform_indices = @transform_8, window_bounds = array<i64: 1, 32>}, {pipeline_mode = #tpu.pipeline_mode<synchronous>, transform_indices = @transform_9, window_bounds = array<i64: 1, 32, 32>}, {pipeline_mode = #tpu.pipeline_mode<synchronous>, transform_indices = @transform_10, window_bounds = array<i64: 1, 1, 32>}, {pipeline_mode = #tpu.pipeline_mode<synchronous>, transform_indices = @transform_11, window_bounds = array<i64: 32, 32>}, {transform_indices = @transform_12, window_bounds = array<i64: 2, 32>}, {transform_indices = @transform_13, window_bounds = array<i64: 2, 8, 32>}]} {
    %c0 = arith.constant 0 : index
    %c0_0 = arith.constant 0 : index
    %0 = vector.load %arg1[%c0, %c0_0] : memref<2x32xf32, #tpu.memory_space<vmem>>, vector<2x32xf32>
    %c0_1 = arith.constant 0 : index
    %c0_2 = arith.constant 0 : index
    %1 = vector.load %arg2[%c0_1, %c0_2] : memref<32x32xf32, #tpu.memory_space<vmem>>, vector<32x32xf32>
    %cst = arith.constant dense<0.000000e+00> : vector<2x32xf32>
    %2 = tpu.matmul %0, %1, %cst {dimension_numbers = #tpu.dot_dimension_numbers<[1], [0], [0], [1], [0, 0, 1, 1], [], []>} : vector<2x32xf32>, vector<32x32xf32>, vector<2x32xf32> -> vector<2x32xf32>
    %c0_3 = arith.constant 0 : index
    %c0_4 = arith.constant 0 : index
    %3 = vector.load %arg3[%c0_3, %c0_4] : memref<1x32xf32, #tpu.memory_space<vmem>>, vector<1x32xf32>
    %4 = vector.broadcast %3 : vector<1x32xf32> to vector<2x32xf32>
    %5 = arith.addf %2, %4 : vector<2x32xf32>
    %cst_5 = arith.constant 0.000000e+00 : f32
    %6 = vector.broadcast %cst_5 : f32 to vector<2x32xf32>
    %7 = arith.maximumf %5, %6 : vector<2x32xf32>
    %c0_6 = arith.constant 0 : index
    %c0_7 = arith.constant 0 : index
    %8 = vector.load %arg4[%c0_6, %c0_7] : memref<32x32xf32, #tpu.memory_space<vmem>>, vector<32x32xf32>
    %cst_8 = arith.constant dense<0.000000e+00> : vector<2x32xf32>
    %9 = tpu.matmul %7, %8, %cst_8 {dimension_numbers = #tpu.dot_dimension_numbers<[1], [0], [0], [1], [0, 0, 1, 1], [], []>} : vector<2x32xf32>, vector<32x32xf32>, vector<2x32xf32> -> vector<2x32xf32>
    %c0_9 = arith.constant 0 : index
    %c0_10 = arith.constant 0 : index
    %10 = vector.load %arg5[%c0_9, %c0_10] : memref<1x32xf32, #tpu.memory_space<vmem>>, vector<1x32xf32>
    %11 = vector.broadcast %10 : vector<1x32xf32> to vector<2x32xf32>
    %12 = arith.addf %9, %11 : vector<2x32xf32>
    %cst_11 = arith.constant 0.000000e+00 : f32
    %13 = vector.broadcast %cst_11 : f32 to vector<2x32xf32>
    %14 = arith.maximumf %12, %13 : vector<2x32xf32>
    %c0_12 = arith.constant 0 : index
    %c0_13 = arith.constant 0 : index
    %15 = vector.load %arg6[%c0_12, %c0_13] : memref<32x32xf32, #tpu.memory_space<vmem>>, vector<32x32xf32>
    %cst_14 = arith.constant dense<0.000000e+00> : vector<2x32xf32>
    %16 = tpu.matmul %14, %15, %cst_14 {dimension_numbers = #tpu.dot_dimension_numbers<[1], [0], [0], [1], [0, 0, 1, 1], [], []>} : vector<2x32xf32>, vector<32x32xf32>, vector<2x32xf32> -> vector<2x32xf32>
    %c0_15 = arith.constant 0 : index
    %c0_16 = arith.constant 0 : index
    %17 = vector.load %arg7[%c0_15, %c0_16] : memref<1x32xf32, #tpu.memory_space<vmem>>, vector<1x32xf32>
    %18 = vector.broadcast %17 : vector<1x32xf32> to vector<2x32xf32>
    %19 = arith.addf %16, %18 : vector<2x32xf32>
    %c0_17 = arith.constant 0 : index
    %c0_18 = arith.constant 0 : index
    %20 = vector.load %arg13[%c0_17, %c0_18] : memref<2x32xf32, #tpu.memory_space<vmem>>, vector<2x32xf32>
    tpu.vector_store %arg13[%c0_17, %c0_18], %19 {strides = array<i32>} : memref<2x32xf32, #tpu.memory_space<vmem>>, vector<2x32xf32>,
    %c0_19 = arith.constant 0 : index
    %c0_20 = arith.constant 0 : index
    %21 = vector.load %arg8[%c0_19, %c0_20] : memref<32x32xf32, #tpu.memory_space<vmem>>, vector<32x32xf32>
    %cst_21 = arith.constant dense<0.000000e+00> : vector<2x32xf32>
    %22 = tpu.matmul %14, %21, %cst_21 {dimension_numbers = #tpu.dot_dimension_numbers<[1], [0], [0], [1], [0, 0, 1, 1], [], []>} : vector<2x32xf32>, vector<32x32xf32>, vector<2x32xf32> -> vector<2x32xf32>
    %c0_22 = arith.constant 0 : index
    %c0_23 = arith.constant 0 : index
    %23 = vector.load %arg9[%c0_22, %c0_23] : memref<1x32xf32, #tpu.memory_space<vmem>>, vector<1x32xf32>
    %24 = vector.broadcast %23 : vector<1x32xf32> to vector<2x32xf32>
    %25 = arith.addf %22, %24 : vector<2x32xf32>
    %26 = arith.mulf %25, %25 : vector<2x32xf32>
    %cst_24 = arith.constant 9.99999974E-5 : f32
    %27 = vector.broadcast %cst_24 : f32 to vector<2x32xf32>
    %28 = arith.addf %26, %27 : vector<2x32xf32>
    %29 = tpu.iota {dimensions = array<i32: 0>} : vector<8x32xi32>
    %30 = tpu.iota {dimensions = array<i32: 1>} : vector<8x32xi32>
    %c4_i32 = arith.constant 4 : i32
    %31 = vector.broadcast %c4_i32 : i32 to vector<8x32xi32>
    %32 = arith.muli %29, %31 : vector<8x32xi32>
    %33 = arith.cmpi sge, %30, %32 : vector<8x32xi32>
    %c4_i32_25 = arith.constant 4 : i32
    %34 = vector.broadcast %c4_i32_25 : i32 to vector<8x32xi32>
    %35 = arith.muli %29, %34 : vector<8x32xi32>
    %c4_i32_26 = arith.constant 4 : i32
    %36 = vector.broadcast %c4_i32_26 : i32 to vector<8x32xi32>
    %37 = arith.addi %35, %36 : vector<8x32xi32>
    %38 = arith.cmpi slt, %30, %37 : vector<8x32xi32>
    %39 = arith.andi %33, %38 : vector<8x32xi1>
    %40 = vector.shape_cast %39 : vector<8x32xi1> to vector<1x8x32xi1>
    %41 = vector.shape_cast %28 : vector<2x32xf32> to vector<2x1x32xf32>
    %cst_27 = arith.constant 0.000000e+00 : f32
    %42 = vector.shape_cast %40 : vector<1x8x32xi1> to vector<1x8x32xi1>
    %43 = vector.broadcast %42 : vector<1x8x32xi1> to vector<2x8x32xi1>
    %44 = vector.shape_cast %41 : vector<2x1x32xf32> to vector<2x1x32xf32>
    %45 = vector.broadcast %44 : vector<2x1x32xf32> to vector<2x8x32xf32>
    %46 = vector.broadcast %cst_27 : f32 to vector<2x8x32xf32>
    %47 = arith.select %43, %45, %46 : vector<2x8x32xi1>, vector<2x8x32xf32>
    %c0_28 = arith.constant 0 : index
    %c0_29 = arith.constant 0 : index
    %48 = vector.load %arg12[%c0_28, %c0_29] : memref<32x32xf32, #tpu.memory_space<vmem>>, vector<32x32xf32>
    %c0_30 = arith.constant 0 : index
    %c0_31 = arith.constant 0 : index
    %c0_32 = arith.constant 0 : index
    %49 = vector.load %arg10[%c0_30, %c0_31, %c0_32] : memref<1x32x32xf32, #tpu.memory_space<vmem>>, vector<1x32x32xf32>
    %50 = vector.shape_cast %49 : vector<1x32x32xf32> to vector<32x32xf32>
    %cst_33 = arith.constant dense<0.000000e+00> : vector<2x32xf32>
    %51 = tpu.matmul %14, %50, %cst_33 {dimension_numbers = #tpu.dot_dimension_numbers<[1], [0], [0], [1], [0, 0, 1, 1], [], []>} : vector<2x32xf32>, vector<32x32xf32>, vector<2x32xf32> -> vector<2x32xf32>
    %c0_34 = arith.constant 0 : index
    %c0_35 = arith.constant 0 : index
    %c0_36 = arith.constant 0 : index
    %52 = vector.load %arg11[%c0_34, %c0_35, %c0_36] : memref<1x1x32xf32, #tpu.memory_space<vmem>>, vector<1x1x32xf32>
    %53 = vector.shape_cast %52 : vector<1x1x32xf32> to vector<1x32xf32>
    %54 = vector.broadcast %53 : vector<1x32xf32> to vector<2x32xf32>
    %55 = arith.addf %51, %54 : vector<2x32xf32>
    %56 = vector.shape_cast %39 : vector<8x32xi1> to vector<1x8x32xi1>
    %57 = vector.shape_cast %55 : vector<2x32xf32> to vector<2x1x32xf32>
    %cst_37 = arith.constant 0.000000e+00 : f32
    %58 = vector.shape_cast %56 : vector<1x8x32xi1> to vector<1x8x32xi1>
    %59 = vector.broadcast %58 : vector<1x8x32xi1> to vector<2x8x32xi1>
    %60 = vector.shape_cast %57 : vector<2x1x32xf32> to vector<2x1x32xf32>
    %61 = vector.broadcast %60 : vector<2x1x32xf32> to vector<2x8x32xf32>
    %62 = vector.broadcast %cst_37 : f32 to vector<2x8x32xf32>
    %63 = arith.select %59, %61, %62 : vector<2x8x32xi1>, vector<2x8x32xf32>
    %64 = vector.shape_cast %63 : vector<2x8x32xf32> to vector<16x32xf32>
    %cst_38 = arith.constant dense<0.000000e+00> : vector<16x32xf32>
    %65 = tpu.matmul %64, %48, %cst_38 {dimension_numbers = #tpu.dot_dimension_numbers<[1], [0], [0], [1], [0, 0, 1, 1], [], []>} : vector<16x32xf32>, vector<32x32xf32>, vector<16x32xf32> -> vector<16x32xf32>
    %66 = vector.shape_cast %65 : vector<16x32xf32> to vector<2x8x32xf32>
    %67 = vector.shape_cast %55 : vector<2x32xf32> to vector<2x1x32xf32>
    %68 = vector.broadcast %67 : vector<2x1x32xf32> to vector<2x8x32xf32>
    %69 = arith.mulf %66, %68 : vector<2x8x32xf32>
    %70 = arith.addf %47, %69 : vector<2x8x32xf32>
    %c0_39 = arith.constant 0 : index
    %c0_40 = arith.constant 0 : index
    %c0_41 = arith.constant 0 : index
    %71 = vector.load %arg14[%c0_39, %c0_40, %c0_41] : memref<2x8x32xf32, #tpu.memory_space<vmem>>, vector<2x8x32xf32>
    tpu.vector_store %arg14[%c0_39, %c0_40, %c0_41], %70 {strides = array<i32>} : memref<2x8x32xf32, #tpu.memory_space<vmem>>, vector<2x8x32xf32>,
    return
  }
  func.func @transform_0(%arg0: i32) -> (i32, i32) {
    %c0_i32 = arith.constant 0 : i32
    %c0_i32_0 = arith.constant 0 : i32
    return %arg0, %c0_i32 : i32, i32
  }
  func.func @transform_1(%arg0: i32) -> (i32, i32) {
    %c0_i32 = arith.constant 0 : i32
    %c0_i32_0 = arith.constant 0 : i32
    %c0_i32_1 = arith.constant 0 : i32
    return %c0_i32, %c0_i32_0 : i32, i32
  }
  func.func @transform_2(%arg0: i32) -> (i32, i32) {
    %c0_i32 = arith.constant 0 : i32
    %c0_i32_0 = arith.constant 0 : i32
    %c0_i32_1 = arith.constant 0 : i32
    return %c0_i32, %c0_i32_0 : i32, i32
  }
  func.func @transform_3(%arg0: i32) -> (i32, i32) {
    %c0_i32 = arith.constant 0 : i32
    %c0_i32_0 = arith.constant 0 : i32
    %c0_i32_1 = arith.constant 0 : i32
    return %c0_i32, %c0_i32_0 : i32, i32
  }
  func.func @transform_4(%arg0: i32) -> (i32, i32) {
    %c0_i32 = arith.constant 0 : i32
    %c0_i32_0 = arith.constant 0 : i32
    %c0_i32_1 = arith.constant 0 : i32
    return %c0_i32, %c0_i32_0 : i32, i32
  }
  func.func @transform_5(%arg0: i32) -> (i32, i32) {
    %c0_i32 = arith.constant 0 : i32
    %c0_i32_0 = arith.constant 0 : i32
    %c0_i32_1 = arith.constant 0 : i32
    return %c0_i32, %c0_i32_0 : i32, i32
  }
  func.func @transform_6(%arg0: i32) -> (i32, i32) {
    %c0_i32 = arith.constant 0 : i32
    %c0_i32_0 = arith.constant 0 : i32
    %c0_i32_1 = arith.constant 0 : i32
    return %c0_i32, %c0_i32_0 : i32, i32
  }
  func.func @transform_7(%arg0: i32) -> (i32, i32) {
    %c0_i32 = arith.constant 0 : i32
    %c0_i32_0 = arith.constant 0 : i32
    %c0_i32_1 = arith.constant 0 : i32
    return %c0_i32, %c0_i32_0 : i32, i32
  }
  func.func @transform_8(%arg0: i32) -> (i32, i32) {
    %c0_i32 = arith.constant 0 : i32
    %c0_i32_0 = arith.constant 0 : i32
    %c0_i32_1 = arith.constant 0 : i32
    return %c0_i32, %c0_i32_0 : i32, i32
  }
  func.func @transform_9(%arg0: i32) -> (i32, i32, i32) {
    %c0_i32 = arith.constant 0 : i32
    %c0_i32_0 = arith.constant 0 : i32
    %c0_i32_1 = arith.constant 0 : i32
    %c0_i32_2 = arith.constant 0 : i32
    return %c0_i32, %c0_i32_0, %c0_i32_1 : i32, i32, i32
  }
  func.func @transform_10(%arg0: i32) -> (i32, i32, i32) {
    %c0_i32 = arith.constant 0 : i32
    %c0_i32_0 = arith.constant 0 : i32
    %c0_i32_1 = arith.constant 0 : i32
    %c0_i32_2 = arith.constant 0 : i32
    return %c0_i32, %c0_i32_0, %c0_i32_1 : i32, i32, i32
  }
  func.func @transform_11(%arg0: i32) -> (i32, i32) {
    %c0_i32 = arith.constant 0 : i32
    %c0_i32_0 = arith.constant 0 : i32
    %c0_i32_1 = arith.constant 0 : i32
    return %c0_i32, %c0_i32_0 : i32, i32
  }
  func.func @transform_12(%arg0: i32) -> (i32, i32) {
    %c0_i32 = arith.constant 0 : i32
    %c0_i32_0 = arith.constant 0 : i32
    return %arg0, %c0_i32 : i32, i32
  }
  func.func @transform_13(%arg0: i32) -> (i32, i32, i32) {
    %c0_i32 = arith.constant 0 : i32
    %c0_i32_0 = arith.constant 0 : i32
    %c0_i32_1 = arith.constant 0 : i32
    return %arg0, %c0_i32, %c0_i32_0 : i32, i32, i32
  }
}

</mosaic_0001>

<bundles_post_ra>
// kernel: tpu_custom_call.1
= control target key start
LH: loop header
LB: loop body
LE: loop exit
PB: predicated region body
PF: predicated region fallthrough
CT: control target
= control target key end

     0   :  { %19 = vsyncpa [#allocation3], 0  ;;  %s1460_s0 = inlined_call_operand.hbm [shape: f32[2,32], index: 0, kind: input, shape index: {}]   ;;  %s1461_s1 = inlined_call_operand.hbm [shape: f32[32,32], index: 1, kind: input, shape index: {}]   ;;  %s1462_s2 = inlined_call_operand.vmem [shape: f32[1,32], index: 2, kind: input, shape index: {}]   ;;  %s1463_s3 = inlined_call_operand.hbm [shape: f32[32,32], index: 3, kind: input, shape index: {}]   ;;  %s1464_s4 = inlined_call_operand.vmem [shape: f32[1,32], index: 4, kind: input, shape index: {}]   ;;  %s1465_s5 = inlined_call_operand.hbm [shape: f32[32,32], index: 5, kind: input, shape index: {}]   ;;  %s1466_s6 = inlined_call_operand.hbm [shape: f32[1,32], index: 6, kind: input, shape index: {}]   ;;  %s1467_s7 = inlined_call_operand.hbm [shape: f32[32,32], index: 7, kind: input, shape index: {}]   ;;  %s1468_s8 = inlined_call_operand.hbm [shape: f32[1,32], index: 8, kind: input, shape index: {}]   ;;  %s1469_s9 = inlined_call_operand.vmem [shape: f32[1,32,32], index: 9, kind: input, shape index: {}]   ;;  %s1470_s10 = inlined_call_operand.vmem [shape: f32[1,1,32], index: 10, kind: input, shape index: {}]   ;;  %s1471_s11 = inlined_call_operand.hbm [shape: f32[32,32], index: 11, kind: input, shape index: {}]   ;;  %s1472_s12 = inlined_call_operand.hbm [shape: f32[2,32], index: 12, kind: output, shape index: {0}]   ;;  %s1473_s13 = inlined_call_operand.hbm [shape: f32[2,8,32], index: 13, kind: output, shape index: {1}]  }
   0x1   :  { %20 = vsyncpa [#allocation6], 0 }
   0x2   :  { %21 = vsyncpa [#allocation9], 0 }
   0x3   :  { %22 = vsyncpa [#allocation12], 0 }
   0x4   :  { %23 = vsyncpa [#allocation15], 0 }
   0x5   :  { %24 = vsyncpa [#allocation4], 0 }
   0x6   :  { %25 = vsyncpa [#allocation18], 0  ;;  %s1174_s25 = smov [#allocation5]   ;;  %s940_s29 = scalar_lea.hbm %s1461_s1, 512 }
   0x7   :  { %s41_s26 = sshll.u32 %s1174_s25, 4  ;;  %p941_p0 = scmp.ne.s32.totalorder %s1461_s1, %s940_s29  ;;  %s42_s26 = int_to_ptr.vmem [resolvable:$true] %s41_s26 }
   0x8   :  { %p944_p1 = scmp.lt.u32.totalorder %s940_s29, %s1461_s1 }
   0xa   :  { %p946_p2 = pnand %p944_p1, %p941_p0 }
   0xc   :  { %949 = shalt.err (!%p946_p2)
}
   0xd   :  { %s950_s17 = scalar_lea.vmem %s42_s26, 512  ;;  %p955_p4 = scmp.lt.s32.totalorder %s42_s26, %s42_s26 }
   0xe   :  { %p951_p3 = scmp.ne.s32.totalorder %s42_s26, %s950_s17  ;;  %p956_p5 = scmp.lt.s32.totalorder %s950_s17, %s950_s17 }
  0x10   :  { %p957_p6 = por %p956_p5, %p955_p4 }
  0x12   :  { %p958_p7 = pnand %p957_p6, %p951_p3 }
  0x14   :  { %961 = shalt.err (!%p958_p7)
}
  0x15   :  { %s1175_s18 = smov 128   ;;  %s1176_s19 = smov 8  }
  0x16   :  { %47 = dma.hbm_to_vmem [thread:$0]  %s1461_s1, 512, %s42_s26, [#allocation6], %s1175_s18, %s1175_s18, %s1176_s19  }
  0x17   :  { %s1177_s22 = smov [#allocation8]   ;;  %s1178_s24 = smov [#allocation11]  }
  0x18   :  { %s69_s23 = sshll.u32 %s1177_s22, 4  ;;  %s91_s25 = sshll.u32 %s1178_s24, 4  ;;  %s70_s23 = int_to_ptr.vmem [resolvable:$true] %s69_s23  ;;  %s92_s25 = int_to_ptr.vmem [resolvable:$true] %s91_s25 }
  0x19   :  { %s962_s29 = scalar_lea.hbm %s1465_s5, 512 }
  0x1a   :  { %p963_p8 = scmp.ne.s32.totalorder %s1465_s5, %s962_s29  ;;  %p966_p9 = scmp.lt.u32.totalorder %s962_s29, %s1465_s5 }
  0x1c   :  { %p968_p10 = pnand %p966_p9, %p963_p8 }
  0x1e   :  { %971 = shalt.err (!%p968_p10)
}
  0x1f   :  { %s972_s1 = scalar_lea.vmem %s70_s23, 512  ;;  %p977_p12 = scmp.lt.s32.totalorder %s70_s23, %s70_s23 }
  0x20   :  { %p973_p11 = scmp.ne.s32.totalorder %s70_s23, %s972_s1  ;;  %p978_p13 = scmp.lt.s32.totalorder %s972_s1, %s972_s1 }
  0x22   :  { %p979_p0 = por %p978_p13, %p977_p12 }
  0x24   :  { %p980_p1 = pnand %p979_p0, %p973_p11 }
  0x26   :  { %983 = shalt.err (!%p980_p1)
}
  0x27   :  { %75 = dma.hbm_to_vmem [thread:$0]  %s1465_s5, 512, %s70_s23, [#allocation9], %s1175_s18, %s1175_s18, %s1176_s19  }
  0x28   :  { %s984_s22 = scalar_lea.hbm %s1467_s7, 512 }
  0x29   :  { %p985_p2 = scmp.ne.s32.totalorder %s1467_s7, %s984_s22  ;;  %p988_p3 = scmp.lt.u32.totalorder %s984_s22, %s1467_s7 }
  0x2b   :  { %p990_p4 = pnand %p988_p3, %p985_p2 }
  0x2d   :  { %993 = shalt.err (!%p990_p4)
}
  0x2e   :  { %s994_s30 = scalar_lea.vmem %s92_s25, 512  ;;  %p999_p6 = scmp.lt.s32.totalorder %s92_s25, %s92_s25 }
  0x2f   :  { %p995_p5 = scmp.ne.s32.totalorder %s92_s25, %s994_s30  ;;  %p1000_p7 = scmp.lt.s32.totalorder %s994_s30, %s994_s30 }
  0x31   :  { %p1001_p8 = por %p1000_p7, %p999_p6 }
  0x33   :  { %p1002_p9 = pnand %p1001_p8, %p995_p5 }
  0x35   :  { %1005 = shalt.err (!%p1002_p9)
}
  0x36   :  { %97 = dma.hbm_to_vmem [thread:$0]  %s1467_s7, 512, %s92_s25, [#allocation12], %s1175_s18, %s1175_s18, %s1176_s19  }
  0x37   :  { %s1179_s14 = smov [#allocation2]   ;;  %s1180_s16 = smov [#allocation7]  }
  0x38   :  { %s32_s15 = sshll.u32 %s1179_s14, 4  ;;  %s55_s1 = sshll.u32 %s1180_s16, 4  ;;  %s33_s15 = int_to_ptr.vmem [resolvable:$true] %s32_s15  ;;  %s56_s1 = int_to_ptr.vmem [resolvable:$true] %s55_s1 }
  0x39   :  { %s1006_s20 = scalar_lea.hbm %s1460_s0, 32 }
  0x3a   :  { %p1007_p10 = scmp.ne.s32.totalorder %s1460_s0, %s1006_s20  ;;  %p1010_p11 = scmp.lt.u32.totalorder %s1006_s20, %s1460_s0 }
  0x3c   :  { %p1012_p12 = pnand %p1010_p11, %p1007_p10 }
  0x3e   :  { %1015 = shalt.err (!%p1012_p12)
}
  0x3f   :  { %s1016_s7 = scalar_lea.vmem %s33_s15, 32  ;;  %p1021_p0 = scmp.lt.s32.totalorder %s33_s15, %s33_s15 }
  0x40   :  { %p1017_p13 = scmp.ne.s32.totalorder %s33_s15, %s1016_s7  ;;  %p1022_p1 = scmp.lt.s32.totalorder %s1016_s7, %s1016_s7 }
  0x42   :  { %p1023_p2 = por %p1022_p1, %p1021_p0 }
  0x44   :  { %p1024_p3 = pnand %p1023_p2, %p1017_p13 }
  0x46   :  { %1027 = shalt.err (!%p1024_p3)
}
  0x47   :  { %35 = dma.hbm_to_vmem [thread:$0]  %s1460_s0, 32, %s33_s15, [#allocation3]  }
  0x48   :  { %s1028_s5 = scalar_lea.hbm %s1463_s3, 512 }
  0x49   :  { %p1029_p4 = scmp.ne.s32.totalorder %s1463_s3, %s1028_s5  ;;  %p1032_p5 = scmp.lt.u32.totalorder %s1028_s5, %s1463_s3 }
  0x4b   :  { %p1034_p6 = pnand %p1032_p5, %p1029_p4 }
  0x4d   :  { %1037 = shalt.err (!%p1034_p6)
}
  0x4e   :  { %s1038_s17 = scalar_lea.vmem %s56_s1, 512  ;;  %p1043_p8 = scmp.lt.s32.totalorder %s56_s1, %s56_s1 }
  0x4f   :  { %p1039_p7 = scmp.ne.s32.totalorder %s56_s1, %s1038_s17  ;;  %p1044_p9 = scmp.lt.s32.totalorder %s1038_s17, %s1038_s17 }
  0x51   :  { %p1045_p10 = por %p1044_p9, %p1043_p8 }
  0x53   :  { %p1046_p11 = pnand %p1045_p10, %p1039_p7 }
  0x55   :  { %1049 = shalt.err (!%p1046_p11)
}
  0x56   :  { %61 = dma.hbm_to_vmem [thread:$0]  %s1463_s3, 512, %s56_s1, [#allocation6], %s1175_s18, %s1175_s18, %s1176_s19  }
  0x57   :  { %s1181_s20 = smov [#allocation10]   ;;  %s1182_s22 = smov [#allocation13]  }
  0x58   :  { %s82_s21 = sshll.u32 %s1181_s20, 4  ;;  %s104_s24 = sshll.u32 %s1182_s22, 4  ;;  %s83_s21 = int_to_ptr.vmem [resolvable:$true] %s82_s21  ;;  %s105_s24 = int_to_ptr.vmem [resolvable:$true] %s104_s24 }
  0x59   :  { %s1050_s25 = scalar_lea.hbm %s1466_s6, 16 }
  0x5a   :  { %p1051_p12 = scmp.ne.s32.totalorder %s1466_s6, %s1050_s25  ;;  %p1054_p13 = scmp.lt.u32.totalorder %s1050_s25, %s1466_s6 }
  0x5c   :  { %p1056_p0 = pnand %p1054_p13, %p1051_p12 }
  0x5e   :  { %1059 = shalt.err (!%p1056_p0)
}
  0x5f   :  { %s1060_s3 = scalar_lea.vmem %s83_s21, 16  ;;  %s1064_s1 = scalar_lea.vmem %s83_s21, 32 }
  0x60   :  { %p1061_p1 = scmp.ne.s32.totalorder %s83_s21, %s1060_s3  ;;  %p1065_p2 = scmp.lt.s32.totalorder %s83_s21, %s83_s21 }
  0x61   :  { %p1066_p3 = scmp.lt.s32.totalorder %s1064_s1, %s1060_s3 }
  0x63   :  { %p1067_p4 = por %p1066_p3, %p1065_p2 }
  0x65   :  { %p1068_p5 = pnand %p1067_p4, %p1061_p1 }
  0x67   :  { %1071 = shalt.err (!%p1068_p5)
}
  0x68   :  { %85 = dma.hbm_to_vmem [thread:$0]  %s1466_s6, 16, %s83_s21, [#allocation9]  }
  0x69   :  { %s1072_s17 = scalar_lea.hbm %s1468_s8, 16 }
  0x6a   :  { %p1073_p6 = scmp.ne.s32.totalorder %s1468_s8, %s1072_s17  ;;  %p1076_p7 = scmp.lt.u32.totalorder %s1072_s17, %s1468_s8 }
  0x6c   :  { %p1078_p8 = pnand %p1076_p7, %p1073_p6 }
  0x6e   :  { %1081 = shalt.err (!%p1078_p8)
}
  0x6f   :  { %s1082_s27 = scalar_lea.vmem %s105_s24, 16  ;;  %s1086_s7 = scalar_lea.vmem %s105_s24, 32 }
  0x70   :  { %p1083_p9 = scmp.ne.s32.totalorder %s105_s24, %s1082_s27  ;;  %p1087_p10 = scmp.lt.s32.totalorder %s105_s24, %s105_s24 }
  0x71   :  { %p1088_p11 = scmp.lt.s32.totalorder %s1086_s7, %s1082_s27 }
  0x73   :  { %p1089_p12 = por %p1088_p11, %p1087_p10 }
  0x75   :  { %p1090_p13 = pnand %p1089_p12, %p1083_p9 }
  0x77   :  { %1093 = shalt.err (!%p1090_p13)
}
  0x78   :  { %107 = dma.hbm_to_vmem [thread:$0]  %s1468_s8, 16, %s105_s24, [#allocation12]  }
  0x79   :  { %s1183_s25 = smov [#allocation14]   ;;  %s1094_s5 = scalar_lea.hbm %s1471_s11, 512 }
  0x7a   :  { %s117_s28 = sshll.u32 %s1183_s25, 4  ;;  %p1095_p0 = scmp.ne.s32.totalorder %s1471_s11, %s1094_s5  ;;  %s118_s28 = int_to_ptr.vmem [resolvable:$true] %s117_s28 }
  0x7b   :  { %p1098_p1 = scmp.lt.u32.totalorder %s1094_s5, %s1471_s11 }
  0x7d   :  { %p1100_p2 = pnand %p1098_p1, %p1095_p0 }
  0x7f   :  { %1103 = shalt.err (!%p1100_p2)
}
  0x80   :  { %s1104_s16 = scalar_lea.vmem %s118_s28, 512  ;;  %p1109_p4 = scmp.lt.s32.totalorder %s118_s28, %s118_s28 }
  0x81   :  { %p1105_p3 = scmp.ne.s32.totalorder %s118_s28, %s1104_s16  ;;  %p1110_p5 = scmp.lt.s32.totalorder %s1104_s16, %s1104_s16 }
  0x83   :  { %p1111_p6 = por %p1110_p5, %p1109_p4 }
  0x85   :  { %p1112_p7 = pnand %p1111_p6, %p1105_p3 }
  0x87   :  { %1115 = shalt.err (!%p1112_p7)
}
  0x88   :  { %123 = dma.hbm_to_vmem [thread:$0]  %s1471_s11, 512, %s118_s28, [#allocation15], %s1175_s18, %s1175_s18, %s1176_s19  }
  0x89   :  { %1160 = dma.done.wait [#allocation3], 32  }
  0x8a   :  { %1161 = vsyncadd [#allocation3], 4294967264 }
  0x8b   :  { %1162 = dma.done.wait [#allocation6], 1024  }
  0x8c   :  { %1163 = vsyncadd [#allocation6], 4294966272 }
  0x8d   :  { %1164 = dma.done.wait [#allocation9], 528  }
  0x8e   :  { %1165 = vsyncadd [#allocation9], 4294966768 }
  0x8f   :  { %1166 = dma.done.wait [#allocation12], 528  }
  0x90   :  { %1167 = vsyncadd [#allocation12], 4294966768 }
  0x91   :  { %1168 = dma.done.wait [#allocation15], 512  }
  0x92   :  { %1169 = vsyncadd [#allocation15], 4294966784  ;;  %v1184_v0 = vmov 0.0|0.0   ;;  %vm1185_vm0 = vmmov 0   ;;  %v1186_v1 = vmov 0.0   ;;  %v149_v2 = vld [vmem:[#allocation5] sm:$0xff]  ;;  %v489_v49 = vlaneseq }
  0x93   :  { %886 = vmatprep.subr.bf16.mxu0 %v1184_v0  ;;  %828 = vmatprep.mubr.msk.f32.mxu0 %vm1185_vm0, %v1186_v1  ;;  %v150_v3 = vld [vmem:[#allocation5 + $0x8] sm:$0xff]  ;;  %v151_v4 = vld [vmem:[#allocation5 + $0x10] sm:$0xff]  ;;  %v152_v6 = vld [vmem:[#allocation5 + $0x18] sm:$0xff]  ;;  %vm160_vm1 = vcmask 261120   ;;  %v1187_v50 = vmov 1966171168  }
  0x94   :  { %892 = vmatprep.subr.bf16.mxu1 %v1184_v0  ;;  %839 = vmatprep.mubr.msk.f32.mxu1 %vm1185_vm0, %v1186_v1  ;;  %v887_v5 = vpack.c.bf16 %v150_v3, %v149_v2  ;;  %v235_v7 = vld [vmem:[#allocation7] sm:$0xff]  ;;  %v236_v8 = vld [vmem:[#allocation7 + $0x8] sm:$0xff]  ;;  %v890_v9 = vpack.c.bf16 %v152_v6, %v151_v4  ;;  %v148_v11 = vld [vmem:[#allocation2] sm:$0x3]  ;;  %v500_v51 = vunpack.c.l.s4 %v1187_v50  ;;  %v490_v52 = vshrl.u32 %v489_v49, 7 }
  0x95   :  { %v893_v10 = vpack.c.bf16 %v236_v8, %v235_v7  ;;  %v237_v12 = vld [vmem:[#allocation7 + $0x10] sm:$0xff]  ;;  %v238_v13 = vld [vmem:[#allocation7 + $0x18] sm:$0xff]  ;;  %v320_v15 = vld [vmem:[#allocation8] sm:$0xff]  ;;  %vm404_vm2 = vcmask 254976  }
  0x96   :  { %888 = vmatpush3.bf16.msra.mxu0 %v887_v5  ;;  %v896_v14 = vpack.c.bf16 %v238_v13, %v237_v12  ;;  %v321_v16 = vld [vmem:[#allocation8 + $0x8] sm:$0xff]  ;;  %v777_v18 = vld [vmem:[%s1462_s2] ss:$0 sm:$0xff]  ;;  %v322_v26 = vld [vmem:[#allocation8 + $0x10] sm:$0xff]  ;;  %v501_v55 = vunpack.c.0.s8 %v500_v51  ;;  %v493_v56 = vmul.u32 4, %v490_v52  ;;  %v525_v6 = vsub.s32 0, %v490_v52 }
  0x97   :  { %889 = vmatprep.subr.bf16.mxu0 %v1184_v0  ;;  %894 = vmatpush3.bf16.msra.mxu1 %v893_v10  ;;  %v899_v17 = vpack.c.bf16 %v321_v16, %v320_v15  ;;  %v406_v19 = vld [vmem:[#allocation11] sm:$0xff]  ;;  %v407_v20 = vld [vmem:[#allocation11 + $0x8] sm:$0xff]  ;;  %v323_v27 = vld [vmem:[#allocation8 + $0x18] sm:$0xff] }
  0x98   :  { %895 = vmatprep.subr.bf16.mxu1 %v1184_v0  ;;  %v905_v24 = vpack.c.bf16 %v407_v20, %v406_v19  ;;  %v902_v28 = vpack.c.bf16 %v323_v27, %v322_v26  ;;  %v408_v29 = vld [vmem:[#allocation11 + $0x10] sm:$0xff]  ;;  %v409_v30 = vld [vmem:[#allocation11 + $0x18] sm:$0xff]  ;;  %v540_v34 = vld [vmem:[%s1469_s9 + $0x8] sm:$0xff]  ;;  %v495_v2 = vadd.s32 4, %v493_v56 }
  0x99   :  { %v908_v31 = vpack.c.bf16 %v409_v30, %v408_v29  ;;  %v779_v32 = vld [vmem:[%s1464_s4] ss:$0 sm:$0xff]  ;;  %v541_v40 = vld [vmem:[%s1469_s9 + $0x10] sm:$0xff]  ;;  %v542_v41 = vld [vmem:[%s1469_s9 + $0x18] sm:$0xff] }
  0x9a   :  { %891 = vmatpush3.bf16.msra.mxu0 %v890_v9  ;;  %v539_v33 = vld [vmem:[%s1469_s9] sm:$0xff]  ;;  %v914_v42 = vpack.c.bf16 %v542_v41, %v541_v40  ;;  %v536_v44 = vld [vmem:[#allocation14 + $0x8] sm:$0xff]  ;;  %v537_v46 = vld [vmem:[#allocation14 + $0x10] sm:$0xff] }
  0x9b   :  { %898 = vmatprep.subr.bf16.mxu0 %v1184_v0  ;;  %897 = vmatpush3.bf16.msra.mxu1 %v896_v14  ;;  %v911_v38 = vpack.c.bf16 %v540_v34, %v539_v33  ;;  %v535_v43 = vld [vmem:[#allocation14] sm:$0xff]  ;;  %v538_v47 = vld [vmem:[#allocation14 + $0x18] sm:$0xff] }
  0x9c   :  { %904 = vmatprep.subr.bf16.mxu1 %v1184_v0  ;;  %v916_v45 = vpack.c.bf16 %v536_v44, %v535_v43  ;;  %v920_v48 = vpack.c.bf16 %v538_v47, %v537_v46  ;;  %v781_v53 = vld [vmem:[#allocation10] ss:$0 sm:$0xff]  ;;  %v783_v54 = vld [vmem:[#allocation13] ss:$0 sm:$0xff]  ;;  %v785_v4 = vld [vmem:[%s1470_s10] ss:$0 sm:$0xff] }
  0x9d   :  { %829 = vmatmul.mubr.msk.f32.vlgmr.msra.gmra.mrb[0].mxu0 %vm160_vm1, %v148_v11  ;;  %s1188_s10 = smov [#allocation16]  }
  0x9e   :  { %850 = vmatprep.mubr.msk.f32.mxu0 %vm1185_vm0, %v1186_v1  ;;  %900 = vmatpush3.bf16.msra.mxu0 %v899_v17  ;;  %s748_s25 = sshll.u32 %s1188_s10, 4  ;;  %s749_s25 = int_to_ptr.vmem [resolvable:$true] %s748_s25 }
  0x9f   :  { %901 = vmatprep.subr.bf16.mxu0 %v1184_v0  ;;  %s1116_s28 = scalar_lea.vmem %s749_s25, 32  ;;  %p1121_p9 = scmp.lt.s32.totalorder %s749_s25, %s749_s25 }
  0xa0   :  { %p1117_p8 = scmp.ne.s32.totalorder %s749_s25, %s1116_s28  ;;  %p1122_p10 = scmp.lt.s32.totalorder %s1116_s28, %s1116_s28 }
  0xa2   :  { %903 = vmatpush3.bf16.msra.mxu0 %v902_v28  ;;  %p1123_p11 = por %p1122_p10, %p1121_p9 }
  0xa3   :  { %910 = vmatprep.subr.bf16.mxu0 %v1184_v0 }
  0xa4   :  { %p1124_p12 = pnand %p1123_p11, %p1117_p8 }
 0x170   :  { %v230_v21 = vpop.f32.mrb[0].mxu0 }
 0x171   :  { %v231_v22 = vadd.f32 %v777_v18, %v230_v21  ;;  %v830_v23 = vpop.f32.mrb[1].mxu0 }
 0x173   :  { %v234_v25 = vmax.f32 %v231_v22, 0.0 }
 0x175   :  { %840 = vmatmul.mubr.msk.f32.vlgmr.msra.gmra.mrb[0].mxu1 %vm160_vm1, %v234_v25 }
 0x176   :  { %906 = vmatpush3.bf16.msra.mxu1 %v905_v24  ;;  %861 = vmatprep.mubr.msk.f32.mxu1 %vm1185_vm0, %v1186_v1 }
 0x177   :  { %907 = vmatprep.subr.bf16.mxu1 %v1184_v0 }
 0x17a   :  { %909 = vmatpush3.bf16.msra.mxu1 %v908_v31 }
 0x17b   :  { %917 = vmatprep.subr.bf16.mxu1 %v916_v45 }
 0x248   :  { %v315_v35 = vpop.f32.mrb[0].mxu1 }
 0x249   :  { %v316_v36 = vadd.f32 %v779_v32, %v315_v35  ;;  %v841_v37 = vpop.f32.mrb[1].mxu1 }
 0x24b   :  { %v319_v39 = vmax.f32 %v316_v36, 0.0 }
 0x24d   :  { %851 = vmatmul.mubr.msk.f32.vlgmr.msra.gmra.mrb[2].mxu0 %vm160_vm1, %v319_v39  ;;  %862 = vmatmul.mubr.msk.f32.vlgmr.msra.gmra.mrb[2].mxu1 %vm160_vm1, %v319_v39 }
 0x24e   :  { %912 = vmatpush3.bf16.msra.mxu0 %v911_v38  ;;  %872 = vmatprep.mubr.msk.f32.mxu0 %vm1185_vm0, %v1186_v1  ;;  %v492_v1 = vand.u32 127, %v489_v49 }
 0x24f   :  { %913 = vmatprep.subr.bf16.mxu0 %v1184_v0  ;;  %919 = vmatpush3.bf16.msra.mxu1 %v916_v45  ;;  %v504_v0 = vsub.s32 %v501_v55, %v490_v52 }
 0x250   :  { %921 = vmatprep.subr.bf16.mxu1 %v920_v48  ;;  %vm494_vm3 = vcmp.ge.s32.totalorder %v492_v1, %v493_v56  ;;  %vm496_vm4 = vcmp.lt.s32.totalorder %v492_v1, %v495_v2 }
 0x251   :  { %vm1417_vm5 = vmand %vm494_vm3, %vm496_vm4 }
 0x252   :  { %915 = vmatpush3.bf16.msra.mxu0 %v914_v42 }
 0x253   :  { %923 = vmatpush3.bf16.msra.mxu1 %v920_v48 }
 0x255   :  { %873 = vmatmul.mubr.msk.f32.vlgmr.msra.gmra.mrb[4].mxu0 %vm160_vm1, %v319_v39 }
 0x320   :  { %v400_v57 = vpop.f32.mrb[2].mxu0  ;;  %v483_v58 = vpop.f32.mrb[2].mxu1 }
 0x321   :  { %v401_v59 = vadd.f32 %v781_v53, %v400_v57  ;;  %v484_v60 = vadd.f32 %v783_v54, %v483_v58  ;;  %v852_v61 = vpop.f32.mrb[3].mxu0  ;;  %v863_v62 = vpop.f32.mrb[3].mxu1 }
 0x323   :  { %v487_v63 = vmul.f32 %v484_v60, %v484_v60  ;;  %405 = vst.msk [vmem:[#allocation16] sm:$0x3] %vm404_vm2, %v401_v59 }
 0x325   :  { %v488_v3 = vadd.f32 0.0001, %v487_v63 }
 0x327   :  { %v505_v5 = vrot.slane %v488_v3, %v504_v0 }
 0x328   :  { %v616_v7 = vpop.f32.mrb[4].mxu0 }
 0x329   :  { %v506_v8 = vcombine.high %v505_v5, %v505_v5  ;;  %v513_v9 = vrot.slane %v505_v5, %v504_v0  ;;  %v617_v10 = vadd.f32 %v785_v4, %v616_v7  ;;  %v874_v11 = vpop.f32.mrb[5].mxu0 }
 0x32b   :  { %v627_v13 = vrot.slane %v617_v10, %v504_v0  ;;  %v520_v14 = vrot.slane %v506_v8, %v504_v0  ;;  %v526_v15 = vrot.slane %v513_v9, %v525_v6 }
 0x32d   :  { %v628_v16 = vcombine.high %v627_v13, %v627_v13  ;;  %v635_v17 = vrot.slane %v627_v13, %v504_v0  ;;  %v530_v18 = vrot.slane %v520_v14, %v525_v6  ;;  %v533_v19 = vsel %vm1417_vm5, %v526_v15, 0.0 }
 0x32f   :  { %v642_v20 = vrot.slane %v628_v16, %v504_v0  ;;  %v646_v21 = vrot.slane %v635_v17, %v525_v6  ;;  %v534_v22 = vsel %vm1417_vm5, %v530_v18, 0.0 }
 0x331   :  { %v653_v23 = vsel %vm1417_vm5, %v646_v21, 0.0  ;;  %v650_v24 = vrot.slane %v642_v20, %v525_v6 }
 0x332   :  { %883 = vmatprep.mubr.msk.f32.mxu1 %vm160_vm1, %v653_v23 }
 0x333   :  { %v654_v25 = vsel %vm1417_vm5, %v650_v24, 0.0 }
 0x334   :  { %884 = vmatmul.mubr.msk.f32.vlgmr.msra.gmra.mrb[4].mxu1 %vm160_vm1, %v654_v25 }
 0x335   :  { %1127 = shalt.err (!%p1124_p12)
}
 0x336   :  { %s1128_s5 = scalar_lea.hbm %s1472_s12, 32 }
 0x337   :  { %p1129_p13 = scmp.ne.s32.totalorder %s1472_s12, %s1128_s5  ;;  %p1132_p0 = scmp.lt.u32.totalorder %s1128_s5, %s1472_s12 }
 0x339   :  { %p1134_p1 = pnand %p1132_p0, %p1129_p13 }
 0x33b   :  { %1137 = shalt.err (!%p1134_p1)
}
 0x33c   :  { %751 = dma.vmem_to_hbm [thread:$0]  %s749_s25, 32, %s1472_s12, [#allocation4]  }
 0x33d   :  { %s1189_s24 = smov [#allocation17]  }
 0x33e   :  { %s757_s11 = sshll.u32 %s1189_s24, 4  ;;  %s758_s11 = int_to_ptr.vmem [resolvable:$true] %s757_s11 }
 0x33f   :  { %s1138_s26 = scalar_lea.vmem %s758_s11, 256  ;;  %p1143_p3 = scmp.lt.s32.totalorder %s758_s11, %s758_s11 }
 0x340   :  { %p1139_p2 = scmp.ne.s32.totalorder %s758_s11, %s1138_s26  ;;  %p1144_p4 = scmp.lt.s32.totalorder %s1138_s26, %s1138_s26 }
 0x342   :  { %p1145_p5 = por %p1144_p4, %p1143_p3 }
 0x344   :  { %p1146_p6 = pnand %p1145_p5, %p1139_p2 }
 0x407   :  { %v885_v26 = vpop.f32.mrb[4].mxu1 }
 0x408   :  { %v737_v27 = vmul.f32 %v885_v26, %v650_v24  ;;  %v727_v28 = vpop.f32.mrb[5].mxu1 }
 0x409   :  { %v736_v29 = vmul.f32 %v727_v28, %v646_v21 }
 0x40a   :  { %v739_v30 = vadd.f32 %v737_v27, %v534_v22 }
 0x40b   :  { %v738_v31 = vadd.f32 %v736_v29, %v533_v19 }
 0x40c   :  { %741 = vst.msk [vmem:[#allocation17 + $0x8] sm:$0xff] %vm160_vm1, %v739_v30 }
 0x40d   :  { %740 = vst.msk [vmem:[#allocation17] sm:$0xff] %vm160_vm1, %v738_v31 }
 0x40e   :  { %1149 = shalt.err (!%p1146_p6)
}
 0x40f   :  { %s1150_s17 = scalar_lea.hbm %s1473_s13, 256 }
 0x410   :  { %p1151_p7 = scmp.ne.s32.totalorder %s1473_s13, %s1150_s17  ;;  %p1154_p8 = scmp.lt.u32.totalorder %s1150_s17, %s1473_s13 }
 0x412   :  { %p1156_p9 = pnand %p1154_p8, %p1151_p7 }
 0x414   :  { %1159 = shalt.err (!%p1156_p9)
}
 0x415   :  { %763 = dma.vmem_to_hbm [thread:$0]  %s758_s11, 256, %s1473_s13, [#allocation18], %s1175_s18, %s1175_s18, %s1176_s19  }
 0x416   :  { %1170 = dma.done.wait [#allocation4], 32  }
 0x417   :  { %1171 = vsyncadd [#allocation4], 4294967264 }
 0x418   :  { %1172 = dma.done.wait [#allocation18], 256  }
 0x419   :  { %1173 = vsyncadd [#allocation18], 4294967040 }
 0x41a   :  { %770 = vsyncpa [#allocation3], 1 }
 0x41b   :  { %771 = vsyncpa [#allocation6], 1 }
 0x41c   :  { %772 = vsyncpa [#allocation9], 1 }
 0x41d   :  { %773 = vsyncpa [#allocation12], 1 }
 0x41e   :  { %774 = vsyncpa [#allocation15], 1 }
 0x41f   :  { %775 = vsyncpa [#allocation4], 1 }
 0x420   :  { %776 = vsyncpa [#allocation18], 1 }

</bundles_post_ra>
